<compile_context>
chip_gen: v6e
topology: v6e:2x2x1
jax: 0.10.0
libtpu: 0.0.40
codegen_flags: <defaults>
</compile_context>

<pallas_src>
import functools

import jax
import jax.numpy as jnp
from jax import lax
from jax.experimental import pallas as pl
from jax.experimental.pallas import tpu as pltpu

F32 = jnp.float32
BF16 = jnp.bfloat16
NORM_EPS = 1e-12   # torch.nn.functional.normalize default eps
BN_EPS = 1e-5      # torch.nn.BatchNorm2d default eps


# ----------------------------- in-kernel helpers -----------------------------

def _l2norm(x, axis):
    # x / max(||x||, eps) == x * rsqrt(max(||x||^2, eps^2))   (rsqrt -> EUP)
    n2 = jnp.sum(x * x, axis=axis, keepdims=True)
    return x * lax.rsqrt(jnp.maximum(n2, NORM_EPS * NORM_EPS))


def _softmax_last(x):
    m = jnp.max(x, axis=-1, keepdims=True)
    e = jnp.exp(x - m)
    # approx reciprocal -> EUP slot (otherwise idle here); error ~1e-3 rel.
    return e * pl.reciprocal(jnp.sum(e, axis=-1, keepdims=True), approx=True)


def _dot(a, b):
    return jnp.dot(a, b, preferred_element_type=jnp.float32)


def _dot_tb(a, b):
    # a @ b.T without materializing the transpose (contract last axes).
    return lax.dot_general(a, b, (((1,), (1,)), ((), ())),
                           preferred_element_type=jnp.float32)


def _dot_ta(a, b):
    # a.T @ b without materializing the transpose (contract first axes).
    return lax.dot_general(a, b, (((0,), (0,)), ((), ())),
                           preferred_element_type=jnp.float32)


# ----------------------------- Pallas kernel ---------------------------------

def _fau_kernel(key_ref, query_ref, w_phi_ref, b_phi_ref, w_phip_ref, b_phip_ref,
                out_ref, *, num_layer, batch_block):
    """`batch_block` batch elements end-to-end: v2l -> l2l^num_layer -> l2v."""
    w_phi = w_phi_ref[...]     # (D, c)  bf16
    b_phi = b_phi_ref[...]     # (D, 1)  f32
    w_phip = w_phip_ref[...]   # (D, c)  bf16
    b_phip = b_phip_ref[...]   # (D, 1)  f32

    def one_element(i, carry):
        kf = key_ref[i]        # (c, Pk) bf16
        qf = query_ref[i]      # (c, Pq) bf16

        # ---- v2l ----
        adj = jnp.maximum(_dot(w_phi, kf) + b_phi, 0.0)          # (D, Pk) f32
        adj = _l2norm(adj, axis=1)                                # over spatial
        latent = _dot_tb(adj.astype(BF16), kf)                    # (D, c)  f32

        # ---- l2l (unrolled, num_layer is static) ----
        for _ in range(num_layer):
            ln = _l2norm(latent, axis=-1)
            aff = _softmax_last(_dot_tb(ln, ln))                  # (D, D)
            latent = _dot(aff, latent)                            # (D, c)

        # ---- l2v ----
        adj2 = jnp.maximum(_dot(w_phip, qf) + b_phip, 0.0)        # (D, Pq) f32
        adj2 = _l2norm(adj2, axis=0)                              # over D
        out_ref[i] = _dot_ta(latent, adj2)                        # (c, Pq)
        return carry

    # Finish each element's serial chain before starting the next; unroll=True
    # keeps the (static, tiny) trip count visible to the scheduler.
    lax.fori_loop(0, batch_block, one_element, None, unroll=True)


# ----------------------------- parameter setup --------------------------------

def _fold_bn(w, gamma, beta, mean, var):
    """Fold inference-mode BatchNorm2d into a bias-free 1x1 conv (out,in)."""
    s = gamma / jnp.sqrt(var + BN_EPS)
    w_f = (w * s[:, None]).astype(F32)
    b_f = ((beta - mean * s)[:, None]).astype(F32)        # (D, 1) column bias
    return w_f, b_f


def init_params(key, kq_channels, latent_dim):
    k_phi, k_phip = jax.random.split(key, 2)
    params = {}
    for name, kk in (("phi", k_phi), ("phi_prime", k_phip)):
        w = jax.random.normal(kk, (latent_dim, kq_channels), F32) / jnp.sqrt(
            jnp.asarray(kq_channels, F32))
        gamma = jnp.ones((latent_dim,), F32)
        beta = jnp.zeros((latent_dim,), F32)
        mean = jnp.zeros((latent_dim,), F32)
        var = jnp.ones((latent_dim,), F32)
        params[name] = _fold_bn(w, gamma, beta, mean, var)
    return params


# ----------------------------- forward wrapper --------------------------------

def _pick_batch_block(b):
    # Grid length 2 keeps both v7x TensorCores fed; >1 element per step
    # amortizes per-step overhead on single-TC v5e/v6e for larger batches.
    if b <= 1:
        return max(b, 1)
    if b % 2 == 0:
        return b // 2
    return 1


def fau_kernel_thw2_forward(query_feature, key_feature, params, *, num_layer=1,
                            batch_block=None):
    """query/key: (B, c, t, H, W) float -> output (B, c, t, Hq, Wq)."""
    b, c, t, hq, wq = query_feature.shape
    _, _, _, hk, wk = key_feature.shape
    pq = t * hq * wq
    pk = t * hk * wk

    w_phi, b_phi = params["phi"]           # (D, c), (D, 1)
    w_phip, b_phip = params["phi_prime"]   # (D, c), (D, 1)
    d = w_phi.shape[0]

    if batch_block is None:
        batch_block = _pick_batch_block(b)
    assert b % batch_block == 0, (b, batch_block)
    grid_len = b // batch_block

    # Pure reshapes (the module's own t -> spatial flattening); bf16 only for
    # the MXU-bound operands (halves the dominant HBM traffic).
    k_flat = key_feature.reshape(b, c, pk).astype(BF16)
    q_flat = query_feature.reshape(b, c, pq).astype(BF16)
    w_phi_b = w_phi.astype(BF16)
    w_phip_b = w_phip.astype(BF16)

    flops = int(b * (4 * d * c * pk + 4 * d * c * pq + num_layer * 4 * d * d * c))
    transcendentals = int(b * (num_layer * (d * d + 3 * d) + 2 * d + pq))
    bytes_accessed = int(k_flat.size * 2 + q_flat.size * 2 + b * c * pq * 4 +
                         2 * d * c * 2 + 2 * d * 4)

    out = pl.pallas_call(
        functools.partial(_fau_kernel, num_layer=num_layer,
                          batch_block=batch_block),
        out_shape=jax.ShapeDtypeStruct((b, c, pq), F32),
        grid=(grid_len,),
        in_specs=[
            pl.BlockSpec((batch_block, c, pk), lambda i: (i, 0, 0)),
            pl.BlockSpec((batch_block, c, pq), lambda i: (i, 0, 0)),
            pl.BlockSpec((d, c), lambda i: (0, 0)),
            pl.BlockSpec((d, 1), lambda i: (0, 0)),
            pl.BlockSpec((d, c), lambda i: (0, 0)),
            pl.BlockSpec((d, 1), lambda i: (0, 0)),
        ],
        out_specs=pl.BlockSpec((batch_block, c, pq), lambda i: (i, 0, 0)),
        compiler_params=pltpu.CompilerParams(
            dimension_semantics=("parallel",)),
        cost_estimate=pl.CostEstimate(flops=flops,
                                      transcendentals=transcendentals,
                                      bytes_accessed=bytes_accessed),
    )(k_flat, q_flat, w_phi_b, b_phi, w_phip_b, b_phip)

    return out.reshape(b, c, t, hq, wq)


# ----------------------------- plain-JAX reference ----------------------------

def _ref_forward(query_feature, key_feature, params, *, num_layer=1):
    b, c, t, hq, wq = query_feature.shape
    _, _, _, hk, wk = key_feature.shape
    kf = key_feature.reshape(b, c, t * hk * wk).astype(F32)
    qf = query_feature.reshape(b, c, t * hq * wq).astype(F32)
    w_phi, b_phi = params["phi"]
    w_phip, b_phip = params["phi_prime"]
    hp = lax.Precision.HIGHEST

    def l2n(x, axis):
        n = jnp.sqrt(jnp.sum(x * x, axis=axis, keepdims=True))
        return x / jnp.maximum(n, NORM_EPS)

    adj = jnp.maximum(
        jnp.einsum("dc,bcp->bdp", w_phi, kf, precision=hp) + b_phi[None], 0.0)
    adj = l2n(adj, axis=2)
    latent = jnp.einsum("bdp,bcp->bdc", adj, kf, precision=hp)
    for _ in range(num_layer):
        ln = l2n(latent, axis=-1)
        aff = jax.nn.softmax(
            jnp.einsum("bdc,bec->bde", ln, ln, precision=hp), axis=-1)
        latent = jnp.einsum("bde,bec->bdc", aff, latent, precision=hp)
    adj2 = jnp.maximum(
        jnp.einsum("dc,bcp->bdp", w_phip, qf, precision=hp) + b_phip[None], 0.0)
    adj2 = l2n(adj2, axis=1)
    vis = jnp.einsum("bdc,bdp->bcp", latent, adj2, precision=hp)
    return vis.reshape(b, c, t, hq, wq)


# ----------------------------- main -------------------------------------------

if __name__ == "__main__":
    b, t = 2, 4
    kq_channels = 16
    latent_dim = 64           # module default
    num_layer = 1             # module default
    hq = wq = hk = wk = 8     # spatial lane dim per element = t*H*W = 256

    root = jax.random.PRNGKey(0)
    k_query, k_key, k_param = jax.random.split(root, 3)
    query = jax.random.normal(k_query, (b, kq_channels, t, hq, wq), F32)
    key = jax.random.normal(k_key, (b, kq_channels, t, hk, wk), F32)
    params = init_params(k_param, kq_channels, latent_dim)

    out = jax.block_until_ready(
        fau_kernel_thw2_forward(query, key, params, num_layer=num_layer))
    assert out.shape == (b, kq_channels, t, hq, wq), out.shape

    ref = jax.block_until_ready(
        _ref_forward(query, key, params, num_layer=num_layer))
    max_err = float(jnp.max(jnp.abs(out - ref)))
    # Kernel matmuls use bf16 MXU operands with f32 accumulation and an
    # EUP-approx softmax reciprocal, compared against an f32-HIGHEST reference,
    # so allow a small numerical gap.
    assert max_err < 3e-2, f"max abs err {max_err}"

    print("KERNEL_OK")
</pallas_src>

<mosaic_0001>
module attributes {stable_mosaic.version = 11 : i64} {
  func.func @_fau_kernel(%arg0: i32, %arg1: memref<1x16x256xbf16, #tpu.memory_space<vmem>>, %arg2: memref<1x16x256xbf16, #tpu.memory_space<vmem>>, %arg3: memref<64x16xbf16, #tpu.memory_space<vmem>>, %arg4: memref<64x1xf32, #tpu.memory_space<vmem>>, %arg5: memref<64x16xbf16, #tpu.memory_space<vmem>>, %arg6: memref<64x1xf32, #tpu.memory_space<vmem>>, %arg7: memref<1x16x256xf32, #tpu.memory_space<vmem>>) attributes {dimension_semantics = [#tpu.dimension_semantics<parallel>], iteration_bounds = array<i64: 2>, scalar_prefetch = 0 : i64, scratch_operands = 0 : i64, tpu.core_type = #tpu.core_type<tc>, window_params = [{transform_indices = @transform_0, window_bounds = array<i64: 1, 16, 256>}, {transform_indices = @transform_1, window_bounds = array<i64: 1, 16, 256>}, {pipeline_mode = #tpu.pipeline_mode<synchronous>, transform_indices = @transform_2, window_bounds = array<i64: 64, 16>}, {pipeline_mode = #tpu.pipeline_mode<synchronous>, transform_indices = @transform_3, window_bounds = array<i64: 64, 1>}, {pipeline_mode = #tpu.pipeline_mode<synchronous>, transform_indices = @transform_4, window_bounds = array<i64: 64, 16>}, {pipeline_mode = #tpu.pipeline_mode<synchronous>, transform_indices = @transform_5, window_bounds = array<i64: 64, 1>}, {transform_indices = @transform_6, window_bounds = array<i64: 1, 16, 256>}]} {
    %c0 = arith.constant 0 : index
    %c0_0 = arith.constant 0 : index
    %0 = vector.load %arg3[%c0, %c0_0] : memref<64x16xbf16, #tpu.memory_space<vmem>>, vector<64x16xbf16>
    %c0_1 = arith.constant 0 : index
    %c0_2 = arith.constant 0 : index
    %1 = vector.load %arg4[%c0_1, %c0_2] : memref<64x1xf32, #tpu.memory_space<vmem>>, vector<64x1xf32>
    %c0_3 = arith.constant 0 : index
    %c0_4 = arith.constant 0 : index
    %2 = vector.load %arg5[%c0_3, %c0_4] : memref<64x16xbf16, #tpu.memory_space<vmem>>, vector<64x16xbf16>
    %c0_5 = arith.constant 0 : index
    %c0_6 = arith.constant 0 : index
    %3 = vector.load %arg6[%c0_5, %c0_6] : memref<64x1xf32, #tpu.memory_space<vmem>>, vector<64x1xf32>
    %c0_i32 = arith.constant 0 : i32
    %4 = arith.index_cast %c0_i32 : i32 to index
    %c0_7 = arith.constant 0 : index
    %c0_8 = arith.constant 0 : index
    %5 = vector.load %arg1[%4, %c0_7, %c0_8] : memref<1x16x256xbf16, #tpu.memory_space<vmem>>, vector<1x16x256xbf16>
    %6 = vector.shape_cast %5 : vector<1x16x256xbf16> to vector<16x256xbf16>
    %7 = arith.index_cast %c0_i32 : i32 to index
    %c0_9 = arith.constant 0 : index
    %c0_10 = arith.constant 0 : index
    %8 = vector.load %arg2[%7, %c0_9, %c0_10] : memref<1x16x256xbf16, #tpu.memory_space<vmem>>, vector<1x16x256xbf16>
    %9 = vector.shape_cast %8 : vector<1x16x256xbf16> to vector<16x256xbf16>
    %cst = arith.constant dense<0.000000e+00> : vector<64x256xf32>
    %10 = tpu.matmul %0, %6, %cst {dimension_numbers = #tpu.dot_dimension_numbers<[1], [0], [0], [1], [0, 0, 1, 1], [], []>} : vector<64x16xbf16>, vector<16x256xbf16>, vector<64x256xf32> -> vector<64x256xf32>
    %11 = vector.broadcast %1 : vector<64x1xf32> to vector<64x256xf32>
    %12 = arith.addf %10, %11 : vector<64x256xf32>
    %cst_11 = arith.constant 0.000000e+00 : f32
    %13 = vector.broadcast %cst_11 : f32 to vector<64x256xf32>
    %14 = arith.maximumf %12, %13 : vector<64x256xf32>
    %15 = arith.mulf %14, %14 : vector<64x256xf32>
    %cst_12 = arith.constant dense<0.000000e+00> : vector<64xf32>
    %16 = vector.multi_reduction <add>, %15, %cst_12 [1] : vector<64x256xf32> to vector<64xf32>
    %17 = vector.shape_cast %16 : vector<64xf32> to vector<64x1xf32>
    %cst_13 = arith.constant 1.000000e-24 : f32
    %18 = vector.broadcast %cst_13 : f32 to vector<64x1xf32>
    %19 = arith.maximumf %17, %18 : vector<64x1xf32>
    %20 = math.rsqrt %19 : vector<64x1xf32>
    %21 = vector.broadcast %20 : vector<64x1xf32> to vector<64x256xf32>
    %22 = arith.mulf %14, %21 : vector<64x256xf32>
    %23 = arith.truncf %22 : vector<64x256xf32> to vector<64x256xbf16>
    %cst_14 = arith.constant dense<0.000000e+00> : vector<64x16xf32>
    %24 = tpu.matmul %23, %6, %cst_14 {dimension_numbers = #tpu.dot_dimension_numbers<[1], [1], [0], [0], [0, 0, 1, 0], [], []>} : vector<64x256xbf16>, vector<16x256xbf16>, vector<64x16xf32> -> vector<64x16xf32>
    %25 = arith.mulf %24, %24 : vector<64x16xf32>
    %cst_15 = arith.constant dense<0.000000e+00> : vector<64xf32>
    %26 = vector.multi_reduction <add>, %25, %cst_15 [1] : vector<64x16xf32> to vector<64xf32>
    %27 = vector.shape_cast %26 : vector<64xf32> to vector<64x1xf32>
    %cst_16 = arith.constant 1.000000e-24 : f32
    %28 = vector.broadcast %cst_16 : f32 to vector<64x1xf32>
    %29 = arith.maximumf %27, %28 : vector<64x1xf32>
    %30 = math.rsqrt %29 : vector<64x1xf32>
    %31 = vector.broadcast %30 : vector<64x1xf32> to vector<64x16xf32>
    %32 = arith.mulf %24, %31 : vector<64x16xf32>
    %cst_17 = arith.constant dense<0.000000e+00> : vector<64x64xf32>
    %33 = tpu.matmul %32, %32, %cst_17 {dimension_numbers = #tpu.dot_dimension_numbers<[1], [1], [0], [0], [0, 0, 1, 0], [], []>} : vector<64x16xf32>, vector<64x16xf32>, vector<64x64xf32> -> vector<64x64xf32>
    %cst_18 = arith.constant dense<0xFF800000> : vector<64xf32>
    %34 = vector.multi_reduction <maximumf>, %33, %cst_18 [1] : vector<64x64xf32> to vector<64xf32>
    %35 = vector.shape_cast %34 : vector<64xf32> to vector<64x1xf32>
    %36 = vector.broadcast %35 : vector<64x1xf32> to vector<64x64xf32>
    %37 = arith.subf %33, %36 : vector<64x64xf32>
    %38 = math.exp %37 : vector<64x64xf32>
    %cst_19 = arith.constant dense<0.000000e+00> : vector<64xf32>
    %39 = vector.multi_reduction <add>, %38, %cst_19 [1] : vector<64x64xf32> to vector<64xf32>
    %40 = vector.shape_cast %39 : vector<64xf32> to vector<64x1xf32>
    %41 = tpu.reciprocal %40 {approx = true} : vector<64x1xf32> -> vector<64x1xf32>
    %42 = vector.broadcast %41 : vector<64x1xf32> to vector<64x64xf32>
    %43 = arith.mulf %38, %42 : vector<64x64xf32>
    %cst_20 = arith.constant dense<0.000000e+00> : vector<64x16xf32>
    %44 = tpu.matmul %43, %24, %cst_20 {dimension_numbers = #tpu.dot_dimension_numbers<[1], [0], [0], [1], [0, 0, 1, 1], [], []>} : vector<64x64xf32>, vector<64x16xf32>, vector<64x16xf32> -> vector<64x16xf32>
    %cst_21 = arith.constant dense<0.000000e+00> : vector<64x256xf32>
    %45 = tpu.matmul %2, %9, %cst_21 {dimension_numbers = #tpu.dot_dimension_numbers<[1], [0], [0], [1], [0, 0, 1, 1], [], []>} : vector<64x16xbf16>, vector<16x256xbf16>, vector<64x256xf32> -> vector<64x256xf32>
    %46 = vector.broadcast %3 : vector<64x1xf32> to vector<64x256xf32>
    %47 = arith.addf %45, %46 : vector<64x256xf32>
    %cst_22 = arith.constant 0.000000e+00 : f32
    %48 = vector.broadcast %cst_22 : f32 to vector<64x256xf32>
    %49 = arith.maximumf %47, %48 : vector<64x256xf32>
    %50 = arith.mulf %49, %49 : vector<64x256xf32>
    %cst_23 = arith.constant dense<0.000000e+00> : vector<256xf32>
    %51 = vector.multi_reduction <add>, %50, %cst_23 [0] : vector<64x256xf32> to vector<256xf32>
    %52 = vector.shape_cast %51 : vector<256xf32> to vector<1x256xf32>
    %cst_24 = arith.constant 1.000000e-24 : f32
    %53 = vector.broadcast %cst_24 : f32 to vector<1x256xf32>
    %54 = arith.maximumf %52, %53 : vector<1x256xf32>
    %55 = math.rsqrt %54 : vector<1x256xf32>
    %56 = vector.broadcast %55 : vector<1x256xf32> to vector<64x256xf32>
    %57 = arith.mulf %49, %56 : vector<64x256xf32>
    %cst_25 = arith.constant dense<0.000000e+00> : vector<16x256xf32>
    %58 = tpu.matmul %44, %57, %cst_25 {dimension_numbers = #tpu.dot_dimension_numbers<[0], [0], [1], [1], [0, 1, 1, 1], [], []>} : vector<64x16xf32>, vector<64x256xf32>, vector<16x256xf32> -> vector<16x256xf32>
    %59 = arith.index_cast %c0_i32 : i32 to index
    %c0_26 = arith.constant 0 : index
    %c0_27 = arith.constant 0 : index
    %60 = vector.load %arg7[%59, %c0_26, %c0_27] : memref<1x16x256xf32, #tpu.memory_space<vmem>>, vector<1x16x256xf32>
    %61 = vector.shape_cast %60 : vector<1x16x256xf32> to vector<16x256xf32>
    %62 = vector.shape_cast %58 : vector<16x256xf32> to vector<1x16x256xf32>
    tpu.vector_store %arg7[%59, %c0_26, %c0_27], %62 {strides = array<i32>} : memref<1x16x256xf32, #tpu.memory_space<vmem>>, vector<1x16x256xf32>,
    %c1_i32 = arith.constant 1 : i32
    return
  }
  func.func @transform_0(%arg0: i32) -> (i32, i32, i32) {
    %c0_i32 = arith.constant 0 : i32
    %c0_i32_0 = arith.constant 0 : i32
    %c0_i32_1 = arith.constant 0 : i32
    return %arg0, %c0_i32, %c0_i32_0 : i32, i32, i32
  }
  func.func @transform_1(%arg0: i32) -> (i32, i32, i32) {
    %c0_i32 = arith.constant 0 : i32
    %c0_i32_0 = arith.constant 0 : i32
    %c0_i32_1 = arith.constant 0 : i32
    return %arg0, %c0_i32, %c0_i32_0 : i32, i32, i32
  }
  func.func @transform_2(%arg0: i32) -> (i32, i32) {
    %c0_i32 = arith.constant 0 : i32
    %c0_i32_0 = arith.constant 0 : i32
    %c0_i32_1 = arith.constant 0 : i32
    return %c0_i32, %c0_i32_0 : i32, i32
  }
  func.func @transform_3(%arg0: i32) -> (i32, i32) {
    %c0_i32 = arith.constant 0 : i32
    %c0_i32_0 = arith.constant 0 : i32
    %c0_i32_1 = arith.constant 0 : i32
    return %c0_i32, %c0_i32_0 : i32, i32
  }
  func.func @transform_4(%arg0: i32) -> (i32, i32) {
    %c0_i32 = arith.constant 0 : i32
    %c0_i32_0 = arith.constant 0 : i32
    %c0_i32_1 = arith.constant 0 : i32
    return %c0_i32, %c0_i32_0 : i32, i32
  }
  func.func @transform_5(%arg0: i32) -> (i32, i32) {
    %c0_i32 = arith.constant 0 : i32
    %c0_i32_0 = arith.constant 0 : i32
    %c0_i32_1 = arith.constant 0 : i32
    return %c0_i32, %c0_i32_0 : i32, i32
  }
  func.func @transform_6(%arg0: i32) -> (i32, i32, i32) {
    %c0_i32 = arith.constant 0 : i32
    %c0_i32_0 = arith.constant 0 : i32
    %c0_i32_1 = arith.constant 0 : i32
    return %arg0, %c0_i32, %c0_i32_0 : i32, i32, i32
  }
}

</mosaic_0001>

<bundles_post_ra>
// kernel: tpu_custom_call.1
= control target key start
LH: loop header
LB: loop body
LE: loop exit
PB: predicated region body
PF: predicated region fallthrough
CT: control target
= control target key end

     0   :  { %11 = vsyncpa [#allocation3], 0  ;;  %s2331_s0 = inlined_call_operand.vmem [shape: bf16[2,16,256], index: 0, kind: input, shape index: {}]   ;;  %s2332_s1 = inlined_call_operand.vmem [shape: bf16[2,16,256], index: 1, kind: input, shape index: {}]   ;;  %s2333_s2 = inlined_call_operand.vmem [shape: bf16[64,16], index: 2, kind: input, shape index: {}]   ;;  %s2334_s3 = inlined_call_operand.vmem [shape: f32[64,1], index: 3, kind: input, shape index: {}]   ;;  %s2335_s4 = inlined_call_operand.vmem [shape: bf16[64,16], index: 4, kind: input, shape index: {}]   ;;  %s2336_s5 = inlined_call_operand.vmem [shape: f32[64,1], index: 5, kind: input, shape index: {}]   ;;  %s2337_s6 = inlined_call_operand.hbm [shape: f32[2,16,256], index: 6, kind: output, shape index: {}]  }
   0x1   :  { %13 = vsyncpa [#allocation3 + $0x1], 0  ;;  %s1847_s21 = smov 0   ;;  %s1849_s22 = smov 0  }
   0x2   :  { %s1851_s23 = smov 0   ;;  %s1853_s24 = smov 0  }
   0x3 LB: > { %s1868_s25 = sadd.s32 4294967295, %s1805_s24   ;;  %s1467_s26 = sadd.s32 4294967294, %s1805_s24   ;;  %s1805_s24 = sphi %s1853_s24, %s2343_s24   ;;  %s1801_s23 = sphi %s1851_s23, %s2342_s23   ;;  %s1797_s22 = sphi %s1849_s22, %s2341_s22   ;;  %s1793_s21 = sphi %s1847_s21, %s2340_s21  }
   0x4   : > { %s1872_s27 = sadd.s32 1, %s1805_s24   ;;  %s162_s28 = sadd.s32 1, %s1801_s23 }
   0x5   : > { %s159_s29 = ssub.s32 %s1805_s24, %s1872_s27  ;;  %p172_p0 = scmp.ne.s32.totalorder %s1801_s23, %s1797_s22 }
   0x6   : > { %p160_p1 = scmp.eq.s32.totalorder %s159_s29, 0  ;;  %p173_p2 = scmp.eq.s32.totalorder %s1868_s25, 1 }
   0x7   : > { %p178_p3 = scmp.ne.s32.totalorder %s1797_s22, %s1793_s21  ;;  %p179_p4 = scmp.eq.s32.totalorder %s1467_s26, 1 }
   0x8   : > { %s1883_s30 = scalar_select %p160_p1, %s1801_s23, %s162_s28  }
   0x9   : > { %p1885_p5 = por %p173_p2, %p172_p0  ;;  %p1889_p6 = por %p179_p4, %p178_p3 }
   0xa   : > { %p1470_p7 = scmp.ge.s32.totalorder %s1805_s24, 1  ;;  %p225_p8 = scmp.lt.s32.totalorder %s1805_s24, 3 }
   0xc   : > { %p226_p9 = pnand %p1470_p7, %p225_p8 }
   0xd   : > { %p260_p10 = scmp.lt.s32.totalorder (!%p226_p9), %s1868_s25, 1  ;;  %s257_s20 = sand.u32 (!%p226_p9), 1, %s1797_s22  }
   0xe   : > { %229 = sbr.rel (%p226_p9) target bundleno = 1847 (0x737), region = 44  ;;  %s1471_s26 = sshll.u32 (!%p226_p9), %s257_s20, 5 }
   0xf   : > { %s259_s29 = scalar_lea.vmem (!%p226_p9), [#allocation2], %s1471_s26  ;;  %s1529_s11 = sshll.u32 (!%p226_p9), %s1868_s25, 9 }
  0x10   : > { %s2289_s14 = scalar_lea.hbm (!%p226_p9), %s2337_s6, %s1529_s11 }
  0x13   : > { %v1807_v0 = vmov 0   ;;  %s261_s9 = scalar_select %p260_p10, %s1868_s25, 1  ;;  %v279_v1 = vld [vmem:[%s2334_s3] sm:$0xff]  ;;  %v280_v2 = vld [vmem:[%s2334_s3 + $0x8] sm:$0xff]  ;;  %v281_v3 = vld [vmem:[%s2334_s3 + $0x10] sm:$0xff]  ;;  %vm377_vm0 = vcmask 130048  }
  0x14   : > { %422 = vmatprep.mubr.bf16.mxu0 %v1807_v0  ;;  %1661 = vset.pattern.permute.xlu0 %v1807_v0  ;;  %v1666_v6 = vld [vmem:[%s2333_s2] sm:$0xff]   ;;  %v282_v7 = vld [vmem:[%s2334_s3 + $0x18] sm:$0xff]  ;;  %v284_v9 = vld [vmem:[%s2334_s3 + $0x28] sm:$0xff]  ;;  %vm809_vm1 = vcmask 523264   ;;  %s1809_s25 = smov [#allocation2]  }
  0x15   : > { %1662 = vset.pattern.permute.xlu1 %v1807_v0  ;;  %s1527_s10 = sshll.u32 %s261_s9, 4  ;;  %309 = vperm.xlu0 %1661, %v279_v1   ;;  %v283_v8 = vld [vmem:[%s2334_s3 + $0x20] sm:$0xff]  ;;  %v285_v10 = vld [vmem:[%s2334_s3 + $0x30] sm:$0xff]  ;;  %v286_v11 = vld [vmem:[%s2334_s3 + $0x38] sm:$0xff]  ;;  %s1393_s9 = sshll.u32 %s259_s29, 4  ;;  %s2284_s9 = int_to_ptr.vmem [resolvable:$true] %s1393_s9 }
  0x16   : > { %s264_s15 = scalar_lea.vmem %s2331_s0, %s1527_s10  ;;  %319 = vperm.xlu1 %1662, %v281_v3   ;;  %s1915_s28 = scalar_lea.vmem %s2332_s1, %s1527_s10  ;;  %v1667_v12 = vld [vmem:[%s2333_s2 + $0x8] sm:$0xff]   ;;  %v1668_v13 = vld [vmem:[%s2333_s2 + $0x10] sm:$0xff]   ;;  %v1669_v14 = vld [vmem:[%s2333_s2 + $0x18] sm:$0xff]  }
  0x17   : > { %v1663_v4 = vld [vmem:[%s264_s15 + $0x4] ss:$8 sps:$4 sm:$0xff]   ;;  %v1665_v5 = vld [vmem:[%s264_s15] ss:$8 sps:$4 sm:$0xff]   ;;  %s2291_s10 = scalar_lea.sflag [#allocation3], %s257_s20  ;;  %s1745_s15 = scalar_lea.vmem %s2284_s9, 512 }
  0x18   : > { %404 = vmatprep.subr.bf16.mxu0 %v1663_v4  ;;  %573 = vmatprep.subr.bf16.mxu1 %v1663_v4  ;;  %p1746_p11 = scmp.ne.s32.totalorder %s2284_s9, %s1745_s15  ;;  %s1749_s16 = sshll.u32 %s1809_s25, 4  ;;  %s1750_s16 = int_to_ptr.vmem [resolvable:$false] %s1749_s16 }
  0x19   : > { %405 = vmatpush1.bf16.msra.mxu0 %v1665_v5  ;;  %314 = vperm.xlu0 %1661, %v280_v2   ;;  %p1752_p0 = scmp.lt.s32.totalorder %s2284_s9, %s1750_s16 }
  0x1a   : > { %324 = vperm.xlu1 %1662, %v282_v7   ;;  %574 = vmatpush1.bf16.xpose.msra.mxu1 %v1665_v5  ;;  %p1747_p12 = pnand %p1746_p11, %p1885_p5 }
  0x1c   : > { %1482 = vmatmul.mubr.msk.bf16.vlgmr.msra.gmra.mxu0 %vm377_vm0, %v1666_v6  ;;  %p1748_p13 = pneg %p1747_p12 }
  0x1d   : > { %432 = vmatprep.mubr.bf16.mxu0 %v1807_v0  ;;  %329 = vperm.xlu0 %1661, %v283_v8  }
  0x1e   : > { %334 = vperm.xlu1 %1662, %v284_v9  }
  0x21   : > { %339 = vperm.xlu0 %1661, %v285_v10  }
  0x22   : > { %344 = vperm.xlu1 %1662, %v286_v11  }
  0x24   : > { %1483 = vmatmul.mubr.msk.bf16.gmra.mxu0 %vm377_vm0, %v1667_v12 }
  0x25   : > { %442 = vmatprep.mubr.bf16.mxu0 %v1807_v0 }
  0x2c   : > { %1484 = vmatmul.mubr.msk.bf16.gmra.mxu0 %vm377_vm0, %v1668_v13 }
  0x2d   : > { %452 = vmatprep.mubr.bf16.mxu0 %v1807_v0 }
  0x34   : > { %1485 = vmatmul.mubr.msk.bf16.gmra.mxu0 %vm377_vm0, %v1669_v14 }
  0x35   : > { %1141 = vmatprep.mubr.bf16.mxu0 %v1807_v0 }
  0x90   : > { %v310_v15 = vpop.permute.xlu0 %309 }
  0x91   : > { %v320_v25 = vpop.permute.xlu1 %319 }
  0x94   : > { %v315_v21 = vpop.permute.xlu0 %314 }
  0x95   : > { %v325_v40 = vpop.permute.xlu1 %324 }
  0x98   : > { %v330_v50 = vpop.permute.xlu0 %329 }
  0x99   : > { %v335_v60 = vpop.permute.xlu1 %334 }
  0x9c   : > { %v340_v7 = vpop.permute.xlu0 %339 }
  0xdc   : > { %v424_v16 = vpop.f32.mrf.mxu0 }
  0xdd   : > { %v425_v17 = vadd.f32 %v424_v16, %v310_v15 }
  0xde   : > { %v426_v18 = vpop.f32.mrf.mxu0 }
  0xdf   : > { %v1952_v19 = vmax.f32 %v425_v17, 0.0  ;;  %v427_v20 = vadd.f32 %v426_v18, %v310_v15  ;;  %v345_v17 = vpop.permute.xlu1 %344 }
  0xe0   : > { %v428_v22 = vpop.f32.mrf.mxu0 }
  0xe1   : > { %v1954_v23 = vmax.f32 %v427_v20, 0.0  ;;  %v429_v24 = vadd.f32 %v428_v22, %v315_v21  ;;  %v479_v27 = vmul.f32 %v1952_v19, %v1952_v19 }
  0xe2   : > { %v430_v26 = vpop.f32.mrf.mxu0 }
  0xe3   : > { %v480_v28 = vmul.f32 %v1954_v23, %v1954_v23  ;;  %v1960_v29 = vmax.f32 %v429_v24, 0.0  ;;  %v431_v30 = vadd.f32 %v430_v26, %v315_v21 }
  0xe4   : > { %v434_v31 = vpop.f32.mrf.mxu0 }
  0xe5   : > { %v1962_v32 = vmax.f32 %v431_v30, 0.0  ;;  %v435_v33 = vadd.f32 %v434_v31, %v320_v25  ;;  %v495_v34 = vadd.f32 %v480_v28, %v479_v27  ;;  %v481_v36 = vmul.f32 %v1960_v29, %v1960_v29 }
  0xe6   : > { %v436_v35 = vpop.f32.mrf.mxu0 }
  0xe7   : > { %v482_v37 = vmul.f32 %v1962_v32, %v1962_v32  ;;  %v1968_v38 = vmax.f32 %v435_v33, 0.0  ;;  %v437_v39 = vadd.f32 %v436_v35, %v320_v25  ;;  %496 = vadd.xlane.f32.xlu0 %v495_v34 }
  0xe8   : > { %v438_v41 = vpop.f32.mrf.mxu0 }
  0xe9   : > { %v1970_v42 = vmax.f32 %v437_v39, 0.0  ;;  %v439_v43 = vadd.f32 %v438_v41, %v325_v40  ;;  %v498_v44 = vadd.f32 %v482_v37, %v481_v36  ;;  %v483_v46 = vmul.f32 %v1968_v38, %v1968_v38 }
  0xea   : > { %v440_v45 = vpop.f32.mrf.mxu0 }
  0xeb   : > { %v484_v47 = vmul.f32 %v1970_v42, %v1970_v42  ;;  %v1976_v48 = vmax.f32 %v439_v43, 0.0  ;;  %v441_v49 = vadd.f32 %v440_v45, %v325_v40  ;;  %499 = vadd.xlane.f32.xlu1 %v498_v44 }
  0xec   : > { %v444_v51 = vpop.f32.mrf.mxu0 }
  0xed   : > { %v1978_v52 = vmax.f32 %v441_v49, 0.0  ;;  %v445_v53 = vadd.f32 %v444_v51, %v330_v50  ;;  %v501_v54 = vadd.f32 %v484_v47, %v483_v46  ;;  %v485_v56 = vmul.f32 %v1976_v48, %v1976_v48 }
  0xee   : > { %v446_v55 = vpop.f32.mrf.mxu0 }
  0xef   : > { %v486_v57 = vmul.f32 %v1978_v52, %v1978_v52  ;;  %v1984_v58 = vmax.f32 %v445_v53, 0.0  ;;  %v447_v59 = vadd.f32 %v446_v55, %v330_v50  ;;  %502 = vadd.xlane.f32.xlu0 %v501_v54 }
  0xf0   : > { %v448_v61 = vpop.f32.mrf.mxu0 }
  0xf1   : > { %v1986_v62 = vmax.f32 %v447_v59, 0.0  ;;  %v449_v63 = vadd.f32 %v448_v61, %v335_v60  ;;  %v504_v1 = vadd.f32 %v486_v57, %v485_v56  ;;  %v487_v3 = vmul.f32 %v1984_v58, %v1984_v58 }
  0xf2   : > { %v450_v2 = vpop.f32.mrf.mxu0 }
  0xf3   : > { %v488_v4 = vmul.f32 %v1986_v62, %v1986_v62  ;;  %v1992_v5 = vmax.f32 %v449_v63, 0.0  ;;  %v451_v6 = vadd.f32 %v450_v2, %v335_v60  ;;  %505 = vadd.xlane.f32.xlu0 %v504_v1 }
  0xf4   : > { %v454_v8 = vpop.f32.mrf.mxu0 }
  0xf5   : > { %v1994_v9 = vmax.f32 %v451_v6, 0.0  ;;  %v455_v10 = vadd.f32 %v454_v8, %v340_v7  ;;  %v507_v11 = vadd.f32 %v488_v4, %v487_v3  ;;  %v489_v13 = vmul.f32 %v1992_v5, %v1992_v5 }
  0xf6   : > { %v456_v12 = vpop.f32.mrf.mxu0 }
  0xf7   : > { %v490_v14 = vmul.f32 %v1994_v9, %v1994_v9  ;;  %v2000_v15 = vmax.f32 %v455_v10, 0.0  ;;  %v457_v16 = vadd.f32 %v456_v12, %v340_v7  ;;  %508 = vadd.xlane.f32.xlu1 %v507_v11 }
  0xf8   : > { %v458_v18 = vpop.f32.mrf.mxu0 }
  0xf9   : > { %v2002_v20 = vmax.f32 %v457_v16, 0.0  ;;  %v459_v21 = vadd.f32 %v458_v18, %v345_v17  ;;  %v510_v22 = vadd.f32 %v490_v14, %v489_v13  ;;  %v491_v25 = vmul.f32 %v2000_v15, %v2000_v15 }
  0xfa   : > { %v460_v24 = vpop.f32.mrf.mxu0 }
  0xfb   : > { %v492_v26 = vmul.f32 %v2002_v20, %v2002_v20  ;;  %v2008_v27 = vmax.f32 %v459_v21, 0.0  ;;  %v461_v28 = vadd.f32 %v460_v24, %v345_v17  ;;  %511 = vadd.xlane.f32.xlu0 %v510_v22 }
  0xfd   : > { %v2010_v30 = vmax.f32 %v461_v28, 0.0  ;;  %v513_v31 = vadd.f32 %v492_v26, %v491_v25  ;;  %v493_v33 = vmul.f32 %v2008_v27, %v2008_v27 }
  0xff   : > { %v494_v34 = vmul.f32 %v2010_v30, %v2010_v30  ;;  %514 = vadd.xlane.f32.xlu1 %v513_v31 }
 0x101   : > { %v516_v35 = vadd.f32 %v494_v34, %v493_v33 }
 0x103   : > { %517 = vadd.xlane.f32.xlu0 %v516_v35 }
 0x170   : > { %v497_v36 = vpop.xlane.xlu0 %496 }
 0x171   : > { %v519_v37 = vmax.f32 %v497_v36, 1e-24 }
 0x173   : > { %1677 = vrsqrt.f32 %v519_v37 }
 0x174   : > { %v500_v39 = vpop.xlane.xlu1 %499 }
 0x175   : > { %v520_v40 = vmax.f32 %v500_v39, 1e-24 }
 0x177   : > { %1679 = vrsqrt.f32 %v520_v40 }
 0x178   : > { %v503_v41 = vpop.xlane.xlu0 %502 }
 0x179   : > { %v521_v43 = vmax.f32 %v503_v41, 1e-24 }
 0x17b   : > { %1681 = vrsqrt.f32 %v521_v43 }
 0x17c   : > { %v506_v44 = vpop.xlane.xlu0 %505 }
 0x17d   : > { %v522_v45 = vmax.f32 %v506_v44, 1e-24 }
 0x17f   : > { %1683 = vrsqrt.f32 %v522_v45 }
 0x180   : > { %v509_v46 = vpop.xlane.xlu1 %508  ;;  %v1678_v47 = vpop.eup %1677 }
 0x181   : > { %v523_v49 = vmax.f32 %v509_v46, 1e-24  ;;  %v536_v53 = vmul.f32 %v1678_v47, %v1954_v23  ;;  %v535_v54 = vmul.f32 %v1678_v47, %v1952_v19 }
 0x183   : > { %1685 = vrsqrt.f32 %v523_v49 }
 0x184   : > { %v1680_v50 = vpop.eup %1679  ;;  %v512_v51 = vpop.xlane.xlu0 %511 }
 0x185   : > { %v524_v55 = vmax.f32 %v512_v51, 1e-24  ;;  %v538_v56 = vmul.f32 %v1680_v50, %v1962_v32  ;;  %v537_v57 = vmul.f32 %v1680_v50, %v1960_v29 }
 0x187   : > { %1687 = vrsqrt.f32 %v524_v55  ;;  %v552_v59 = vpack.c.bf16 %v538_v56, %v536_v53  ;;  %v551_v60 = vpack.c.bf16 %v537_v57, %v535_v54 }
 0x188   : > { %v515_v61 = vpop.xlane.xlu1 %514  ;;  %v1682_v63 = vpop.eup %1681 }
 0x189   : > { %v525_v1 = vmax.f32 %v515_v61, 1e-24  ;;  %591 = vmatprep.mubr.bf16.mxu1 %v552_v59  ;;  %v540_v23 = vmul.f32 %v1682_v63, %v1970_v42  ;;  %v539_v19 = vmul.f32 %v1682_v63, %v1968_v38 }
 0x18a   : > { %592 = vmatmul.mubr.bf16.vlgmr.msra.gmra.mxu1 %v551_v60 }
 0x18b   : > { %1689 = vrsqrt.f32 %v525_v1 }
 0x18c   : > { %v1684_v2 = vpop.eup %1683  ;;  %v518_v3 = vpop.xlane.xlu0 %517 }
 0x18d   : > { %v526_v4 = vmax.f32 %v518_v3, 1e-24  ;;  %v542_v32 = vmul.f32 %v1684_v2, %v1978_v52  ;;  %v541_v29 = vmul.f32 %v1684_v2, %v1976_v48 }
 0x18f   : > { %1691 = vrsqrt.f32 %v526_v4  ;;  %v554_v6 = vpack.c.bf16 %v542_v32, %v540_v23  ;;  %v553_v7 = vpack.c.bf16 %v541_v29, %v539_v19 }
 0x190   : > { %v1686_v8 = vpop.eup %1685 }
 0x191   : > { %599 = vmatprep.mubr.bf16.mxu1 %v554_v6  ;;  %v544_v11 = vmul.f32 %v1686_v8, %v1986_v62  ;;  %v543_v42 = vmul.f32 %v1686_v8, %v1984_v58 }
 0x192   : > { %600 = vmatmul.mubr.bf16.gmra.mxu1 %v553_v7 }
 0x194   : > { %v1688_v10 = vpop.eup %1687 }
 0x195   : > { %v546_v12 = vmul.f32 %v1688_v10, %v1994_v9  ;;  %v545_v38 = vmul.f32 %v1688_v10, %v1992_v5 }
 0x197   : > { %v556_v13 = vpack.c.bf16 %v546_v12, %v544_v11  ;;  %v555_v14 = vpack.c.bf16 %v545_v38, %v543_v42 }
 0x198   : > { %v1690_v52 = vpop.eup %1689 }
 0x199   : > { %607 = vmatprep.mubr.bf16.mxu1 %v556_v13  ;;  %v548_v16 = vmul.f32 %v1690_v52, %v2002_v20  ;;  %v547_v18 = vmul.f32 %v1690_v52, %v2000_v15 }
 0x19a   : > { %608 = vmatmul.mubr.bf16.gmra.mxu1 %v555_v14 }
 0x19c   : > { %v1692_v48 = vpop.eup %1691 }
 0x19d   : > { %v550_v17 = vmul.f32 %v1692_v48, %v2010_v30  ;;  %v549_v62 = vmul.f32 %v1692_v48, %v2008_v27 }
 0x19f   : > { %v558_v21 = vpack.c.bf16 %v550_v17, %v548_v16  ;;  %v557_v9 = vpack.c.bf16 %v549_v62, %v547_v18 }
 0x1a1   : > { %615 = vmatprep.mubr.bf16.mxu1 %v558_v21 }
 0x1a2   : > { %616 = vmatmul.mubr.bf16.gmra.mxu1 %v557_v9 }
 0x24a   : > { %v2032_v58 = vpop.f32.mrf.mxu1 }
 0x24b   : > { %v624_v50 = vmul.f32 %v2032_v58, %v2032_v58 }
 0x24c   : > { %v595_v5 = vpop.f32.mrf.mxu1 }
 0x24d   : > { %v632_v53 = vsel %vm377_vm0, %v624_v50, 0.0 }
 0x24e   : > { %v2034_v22 = vpop.f32.mrf.mxu1 }
 0x24f   : > { %v625_v55 = vmul.f32 %v2034_v22, %v2034_v22 }
 0x250   : > { %v598_v24 = vpop.f32.mrf.mxu1 }
 0x251   : > { %v635_v56 = vsel %vm377_vm0, %v625_v55, 0.0  ;;  %v1670_v24 = vld [vmem:[%s1915_s28] ss:$8 sps:$4 sm:$0xff]  }
 0x252   : > { %v2036_v25 = vpop.f32.mrf.mxu1 }
 0x253   : > { %v626_v45 = vmul.f32 %v2036_v25, %v2036_v25 }
 0x254   : > { %v603_v26 = vpop.f32.mrf.mxu1 }
 0x255   : > { %v638_v47 = vsel %vm377_vm0, %v626_v45, 0.0  ;;  %v1672_v26 = vld [vmem:[%s1915_s28 + $0x4] ss:$8 sps:$4 sm:$0xff]   ;;  %s1751_s28 = scalar_lea.vmem %s1750_s16, 1024 }
 0x256   : > { %v2038_v20 = vpop.f32.mrf.mxu1  ;;  %1123 = vmatprep.subr.bf16.mxu0 %v1672_v26  ;;  %v299_v26 = vld [vmem:[%s2336_s5 + $0x20] sm:$0xff]  ;;  %p1753_p1 = scmp.lt.s32.totalorder %s1751_s28, %s1745_s15 }
 0x257   : > { %v627_v51 = vmul.f32 %v2038_v20, %v2038_v20  ;;  %1124 = vmatpush1.bf16.msra.mxu0 %v1670_v24  ;;  %v297_v24 = vld [vmem:[%s2336_s5 + $0x10] sm:$0xff] }
 0x258   : > { %v606_v28 = vpop.f32.mrf.mxu1  ;;  %p1754_p2 = por %p1753_p1, %p1752_p0 }
 0x259   : > { %v641_v54 = vsel %vm377_vm0, %v627_v51, 0.0 }
 0x25a   : > { %v2040_v30 = vpop.f32.mrf.mxu1  ;;  %p1755_p3 = pnand %p1754_p2, %p1748_p13 }
 0x25b   : > { %v628_v37 = vmul.f32 %v2040_v30, %v2040_v30 }
 0x25c   : > { %v611_v15 = vpop.f32.mrf.mxu1 }
 0x25d   : > { %v644_v43 = vsel %vm377_vm0, %v628_v37, 0.0 }
 0x25e   : > { %v2042_v27 = vpop.f32.mrf.mxu1 }
 0x25f   : > { %v629_v46 = vmul.f32 %v2042_v27, %v2042_v27 }
 0x260   : > { %v614_v31 = vpop.f32.mrf.mxu1 }
 0x261   : > { %v647_v49 = vsel %vm377_vm0, %v629_v46, 0.0 }
 0x262   : > { %v2044_v33 = vpop.f32.mrf.mxu1 }
 0x263   : > { %v630_v34 = vmul.f32 %v2044_v33, %v2044_v33 }
 0x264   : > { %v619_v35 = vpop.f32.mrf.mxu1 }
 0x265   : > { %v650_v36 = vsel %vm377_vm0, %v630_v34, 0.0 }
 0x266   : > { %651 = vadd.xlane.f32.xlu0 %v650_v36  ;;  %v2051_v39 = vpop.f32.mrf.mxu1 }
 0x267   : > { %v631_v40 = vmul.f32 %v2051_v39, %v2051_v39 }
 0x268   : > { %v622_v41 = vpop.f32.mrf.mxu1 }
 0x269   : > { %v653_v44 = vsel %vm377_vm0, %v631_v40, 0.0 }
 0x26a   : > { %645 = vadd.xlane.f32.xlu0 %v644_v43  ;;  %654 = vadd.xlane.f32.xlu1 %v653_v44 }
 0x26e   : > { %639 = vadd.xlane.f32.xlu0 %v638_v47  ;;  %648 = vadd.xlane.f32.xlu1 %v647_v49 }
 0x272   : > { %633 = vadd.xlane.f32.xlu0 %v632_v53  ;;  %642 = vadd.xlane.f32.xlu1 %v641_v54 }
 0x276   : > { %636 = vadd.xlane.f32.xlu1 %v635_v56 }
 0x2ef   : > { %v652_v57 = vpop.xlane.xlu0 %651 }
 0x2f0   : > { %v662_v59 = vmax.f32 %v652_v57, 1e-24 }
 0x2f2   : > { %1693 = vrsqrt.f32 %v662_v59 }
 0x2f3   : > { %v646_v60 = vpop.xlane.xlu0 %645  ;;  %v655_v61 = vpop.xlane.xlu1 %654 }
 0x2f4   : > { %v663_v63 = vmax.f32 %v655_v61, 1e-24  ;;  %v660_v23 = vmax.f32 %v646_v60, 1e-24 }
 0x2f6   : > { %1695 = vrsqrt.f32 %v663_v63 }
 0x2f7   : > { %v640_v1 = vpop.xlane.xlu0 %639  ;;  %v649_v2 = vpop.xlane.xlu1 %648 }
 0x2f8   : > { %v661_v3 = vmax.f32 %v649_v2, 1e-24  ;;  %v658_v7 = vmax.f32 %v640_v1, 1e-24 }
 0x2fa   : > { %1697 = vrsqrt.f32 %v661_v3 }
 0x2fb   : > { %v634_v19 = vpop.xlane.xlu0 %633  ;;  %v643_v32 = vpop.xlane.xlu1 %642 }
 0x2fc   : > { %v656_v4 = vmax.f32 %v634_v19, 1e-24  ;;  %v659_v29 = vmax.f32 %v643_v32, 1e-24 }
 0x2fe   : > { %1699 = vrsqrt.f32 %v656_v4 }
 0x2ff   : > { %1701 = vrsqrt.f32 %v660_v23  ;;  %v1694_v6 = vpop.eup %1693  ;;  %v637_v10 = vpop.xlane.xlu1 %636 }
 0x300   : > { %1703 = vrsqrt.f32 %v659_v29  ;;  %v657_v12 = vmax.f32 %v637_v10, 1e-24  ;;  %v678_v42 = vmul.f32 %v1694_v6, %v2044_v33 }
 0x301   : > { %1705 = vrsqrt.f32 %v658_v7 }
 0x302   : > { %1707 = vrsqrt.f32 %v657_v12 }
 0x303   : > { %v1696_v8 = vpop.eup %1695 }
 0x304   : > { %v679_v11 = vmul.f32 %v1696_v8, %v2051_v39 }
 0x306   : > { %1562 = vmatprep.subr.msk.mxu1 %vm377_vm0, %v679_v11 }
 0x307   : > { %v1698_v38 = vpop.eup %1697  ;;  %1563 = vmatpush3.xpose.msk.msra.mxu1 %vm377_vm0, %v679_v11 }
 0x308   : > { %1564 = vmatprep.subr.msk.mxu1 %vm377_vm0, %v678_v42  ;;  %v677_v14 = vmul.f32 %v1698_v38, %v2042_v27 }
 0x30b   : > { %v1700_v13 = vpop.eup %1699  ;;  %1565 = vmatpush3.xpose.msk.msra.mxu1 %vm377_vm0, %v678_v42 }
 0x30c   : > { %v1702_v52 = vpop.eup %1701  ;;  %v672_v48 = vmul.f32 %v1700_v13, %v2032_v58  ;;  %1566 = vmatprep.subr.msk.mxu1 %vm377_vm0, %v677_v14 }
 0x30d   : > { %v676_v16 = vmul.f32 %v1702_v52, %v2040_v30  ;;  %v1704_v17 = vpop.eup %1703 }
 0x30e   : > { %1578 = vmatprep.mubr.msk.f32.mxu1 %vm377_vm0, %v672_v48  ;;  %v675_v18 = vmul.f32 %v1704_v17, %v2038_v20  ;;  %v1706_v62 = vpop.eup %1705 }
 0x30f   : > { %1567 = vmatpush3.xpose.msk.msra.mxu1 %vm377_vm0, %v677_v14  ;;  %v674_v21 = vmul.f32 %v1706_v62, %v2036_v25  ;;  %v1708_v9 = vpop.eup %1707 }
 0x310   : > { %1568 = vmatprep.subr.msk.mxu1 %vm377_vm0, %v676_v16  ;;  %v673_v5 = vmul.f32 %v1708_v9, %v2034_v22  ;;  %v295_v9 = vld [vmem:[%s2336_s5] sm:$0xff] }
 0x313   : > { %1569 = vmatpush3.xpose.msk.msra.mxu1 %vm377_vm0, %v676_v16 }
 0x314   : > { %1570 = vmatprep.subr.msk.mxu1 %vm377_vm0, %v675_v18 }
 0x317   : > { %1571 = vmatpush3.xpose.msk.msra.mxu1 %vm377_vm0, %v675_v18 }
 0x318   : > { %1572 = vmatprep.subr.msk.mxu1 %vm377_vm0, %v674_v21 }
 0x31b   : > { %1573 = vmatpush3.xpose.msk.msra.mxu1 %vm377_vm0, %v674_v21 }
 0x31c   : > { %1574 = vmatprep.subr.msk.mxu1 %vm377_vm0, %v673_v5 }
 0x31f   : > { %1575 = vmatpush3.xpose.msk.msra.mxu1 %vm377_vm0, %v673_v5 }
 0x320   : > { %1576 = vmatprep.subr.msk.mxu1 %vm377_vm0, %v672_v48 }
 0x323   : > { %1577 = vmatpush3.xpose.msk.msra.mxu1 %vm377_vm0, %v672_v48 }
 0x324   : > { %1590 = vmatprep.subr.mxu1 %v2051_v39 }
 0x326   : > { %1579 = vmatmul.mubr.msk.f32.vlgmr.msra.gmra.mxu1 %vm377_vm0, %v673_v5  ;;  %v296_v5 = vld [vmem:[%s2336_s5 + $0x8] sm:$0xff] }
 0x327   : > { %1581 = vmatprep.mubr.msk.f32.mxu1 %vm377_vm0, %v674_v21  ;;  %1591 = vmatpush3.msra.mxu1 %v2051_v39 }
 0x328   : > { %1592 = vmatprep.subr.mxu1 %v2044_v33 }
 0x329   : > { %1593 = vmatpush3.msra.mxu1 %v2044_v33 }
 0x32a   : > { %1582 = vmatmul.mubr.msk.f32.gmra.mxu1 %vm377_vm0, %v675_v18  ;;  %1594 = vmatprep.subr.mxu1 %v2042_v27 }
 0x32b   : > { %1584 = vmatprep.mubr.msk.f32.mxu1 %vm377_vm0, %v676_v16  ;;  %1595 = vmatpush3.msra.mxu1 %v2042_v27 }
 0x32c   : > { %1596 = vmatprep.subr.mxu1 %v2040_v30 }
 0x32d   : > { %1597 = vmatpush3.msra.mxu1 %v2040_v30 }
 0x32e   : > { %1585 = vmatmul.mubr.msk.f32.gmra.mxu1 %vm377_vm0, %v677_v14  ;;  %1598 = vmatprep.subr.mxu1 %v2038_v20 }
 0x32f   : > { %1587 = vmatprep.mubr.msk.f32.mxu1 %vm377_vm0, %v678_v42  ;;  %1599 = vmatpush3.msra.mxu1 %v2038_v20  ;;  %v1673_v20 = vld [vmem:[%s2335_s4] sm:$0xff]  }
 0x330   : > { %1600 = vmatprep.subr.mxu1 %v2036_v25  ;;  %1516 = vmatmul.mubr.msk.bf16.vlgmr.msra.gmra.mxu0 %vm377_vm0, %v1673_v20  ;;  %v298_v20 = vld [vmem:[%s2336_s5 + $0x18] sm:$0xff] }
 0x331   : > { %1601 = vmatpush3.msra.mxu1 %v2036_v25  ;;  %1151 = vmatprep.mubr.bf16.mxu0 %v1807_v0  ;;  %v1676_v25 = vld [vmem:[%s2335_s4 + $0x18] sm:$0xff]  }
 0x332   : > { %1588 = vmatmul.mubr.msk.f32.gmra.mxu1 %vm377_vm0, %v679_v11  ;;  %1602 = vmatprep.subr.mxu1 %v2034_v22 }
 0x333   : > { %1603 = vmatpush3.msra.mxu1 %v2034_v22  ;;  %v1674_v22 = vld [vmem:[%s2335_s4 + $0x8] sm:$0xff]  }
 0x334   : > { %1604 = vmatprep.subr.mxu1 %v2032_v58 }
 0x335   : > { %1605 = vmatpush3.msra.mxu1 %v2032_v58  ;;  %v1675_v58 = vld [vmem:[%s2335_s4 + $0x10] sm:$0xff]  }
 0x338   : > { %1517 = vmatmul.mubr.msk.bf16.gmra.mxu0 %vm377_vm0, %v1674_v22  ;;  %v301_v22 = vld [vmem:[%s2336_s5 + $0x30] sm:$0xff] }
 0x339   : > { %1161 = vmatprep.mubr.bf16.mxu0 %v1807_v0 }
 0x340   : > { %1518 = vmatmul.mubr.msk.bf16.gmra.mxu0 %vm377_vm0, %v1675_v58  ;;  %v300_v58 = vld [vmem:[%s2336_s5 + $0x28] sm:$0xff] }
 0x341   : > { %1171 = vmatprep.mubr.bf16.mxu0 %v1807_v0 }
 0x348   : > { %1519 = vmatmul.mubr.msk.bf16.gmra.mxu0 %vm377_vm0, %v1676_v25  ;;  %v302_v25 = vld [vmem:[%s2336_s5 + $0x38] sm:$0xff] }
 0x3e6   : > { %v1580_v28 = vpop.f32.mrf.mxu1 }
 0x3e7   : > { %v813_v30 = vsel %vm809_vm1, %v1580_v28, -inf }
 0x3e8   : > { %814 = vmax.xlane.f32.xlu0 %v813_v30  ;;  %v770_v15 = vpop.f32.mrf.mxu1 }
 0x3e9   : > { %v810_v27 = vsel %vm809_vm1, %v770_v15, -inf }
 0x3ea   : > { %811 = vmax.xlane.f32.xlu1 %v810_v27  ;;  %v1583_v31 = vpop.f32.mrf.mxu1 }
 0x3eb   : > { %v819_v33 = vsel %vm809_vm1, %v1583_v31, -inf }
 0x3ec   : > { %820 = vmax.xlane.f32.xlu0 %v819_v33  ;;  %v780_v0 = vpop.f32.mrf.mxu1 }
 0x3ed   : > { %v816_v34 = vsel %vm809_vm1, %v780_v0, -inf }
 0x3ee   : > { %817 = vmax.xlane.f32.xlu1 %v816_v34  ;;  %v1586_v35 = vpop.f32.mrf.mxu1 }
 0x3ef   : > { %v825_v36 = vsel %vm809_vm1, %v1586_v35, -inf }
 0x3f0   : > { %826 = vmax.xlane.f32.xlu0 %v825_v36  ;;  %v790_v37 = vpop.f32.mrf.mxu1 }
 0x3f1   : > { %v822_v39 = vsel %vm809_vm1, %v790_v37, -inf }
 0x3f2   : > { %823 = vmax.xlane.f32.xlu1 %v822_v39  ;;  %v1589_v40 = vpop.f32.mrf.mxu1 }
 0x3f3   : > { %v831_v41 = vsel %vm809_vm1, %v1589_v40, -inf }
 0x3f4   : > { %832 = vmax.xlane.f32.xlu0 %v831_v41  ;;  %v800_v43 = vpop.f32.mrf.mxu1 }
 0x3f5   : > { %v828_v44 = vsel %vm809_vm1, %v800_v43, -inf }
 0x3f6   : > { %829 = vmax.xlane.f32.xlu1 %v828_v44 }
 0x471   : > { %v815_v45 = vpop.xlane.xlu0 %814 }
 0x472   : > { %v835_v46 = vsub.f32 %v1580_v28, %v815_v45  ;;  %v1143_v28 = vpop.f32.mrf.mxu0 }
 0x473   : > { %v812_v47 = vpop.xlane.xlu1 %811 }
 0x474   : > { %v844_v49 = vmul.f32 1.442695, %v835_v46  ;;  %v834_v50 = vsub.f32 %v770_v15, %v812_v47  ;;  %v1145_v30 = vpop.f32.mrf.mxu0 }
 0x475   : > { %v821_v51 = vpop.xlane.xlu0 %820 }
 0x476   : > { %1709 = vpow2.f32 %v844_v49  ;;  %v842_v53 = vmul.f32 1.442695, %v834_v50  ;;  %v837_v54 = vsub.f32 %v1583_v31, %v821_v51  ;;  %v1147_v15 = vpop.f32.mrf.mxu0 }
 0x477   : > { %v818_v55 = vpop.xlane.xlu1 %817 }
 0x478   : > { %1711 = vpow2.f32 %v842_v53  ;;  %v848_v56 = vmul.f32 1.442695, %v837_v54  ;;  %v836_v57 = vsub.f32 %v780_v0, %v818_v55  ;;  %v1149_v27 = vpop.f32.mrf.mxu0 }
 0x479   : > { %v827_v59 = vpop.xlane.xlu0 %826 }
 0x47a   : > { %1713 = vpow2.f32 %v848_v56  ;;  %v846_v60 = vmul.f32 1.442695, %v836_v57  ;;  %v839_v61 = vsub.f32 %v1586_v35, %v827_v59  ;;  %v1153_v31 = vpop.f32.mrf.mxu0 }
 0x47b   : > { %v824_v63 = vpop.xlane.xlu1 %823 }
 0x47c   : > { %1715 = vpow2.f32 %v846_v60  ;;  %v852_v1 = vmul.f32 1.442695, %v839_v61  ;;  %v838_v2 = vsub.f32 %v790_v37, %v824_v63  ;;  %v1155_v33 = vpop.f32.mrf.mxu0 }
 0x47d   : > { %v833_v3 = vpop.xlane.xlu0 %832 }
 0x47e   : > { %1717 = vpow2.f32 %v852_v1  ;;  %v850_v23 = vmul.f32 1.442695, %v838_v2  ;;  %v841_v19 = vsub.f32 %v1589_v40, %v833_v3  ;;  %v2205_v0 = vpop.f32.mrf.mxu0 }
 0x47f   : > { %v830_v4 = vpop.xlane.xlu1 %829 }
 0x480   : > { %1719 = vpow2.f32 %v850_v23  ;;  %v856_v32 = vmul.f32 1.442695, %v841_v19  ;;  %v840_v29 = vsub.f32 %v800_v43, %v830_v4  ;;  %v2207_v35 = vpop.f32.mrf.mxu0 }
 0x482   : > { %1721 = vpow2.f32 %v856_v32  ;;  %v854_v6 = vmul.f32 1.442695, %v840_v29  ;;  %v1163_v39 = vpop.f32.mrf.mxu0 }
 0x483   : > { %v2149_v7 = vpop.eup %1709 }
 0x484   : > { %1723 = vpow2.f32 %v854_v6  ;;  %v861_v8 = vsel %vm809_vm1, %v2149_v7, 0.0  ;;  %v1165_v43 = vpop.f32.mrf.mxu0 }
 0x485   : > { %v2153_v10 = vpop.eup %1711  ;;  %862 = vadd.xlane.f32.xlu0 %v861_v8 }
 0x486   : > { %v858_v11 = vsel %vm809_vm1, %v2153_v10, 0.0  ;;  %v2209_v45 = vpop.f32.mrf.mxu0 }
 0x487   : > { %v2157_v12 = vpop.eup %1713  ;;  %859 = vadd.xlane.f32.xlu1 %v858_v11 }
 0x488   : > { %v867_v42 = vsel %vm809_vm1, %v2157_v12, 0.0  ;;  %v1169_v55 = vpop.f32.mrf.mxu0 }
 0x489   : > { %v2161_v38 = vpop.eup %1715  ;;  %868 = vadd.xlane.f32.xlu0 %v867_v42 }
 0x48a   : > { %v864_v13 = vsel %vm809_vm1, %v2161_v38, 0.0  ;;  %v1173_v4 = vpop.f32.mrf.mxu0 }
 0x48b   : > { %v2165_v14 = vpop.eup %1717  ;;  %865 = vadd.xlane.f32.xlu1 %v864_v13 }
 0x48c   : > { %v873_v52 = vsel %vm809_vm1, %v2165_v14, 0.0 }
 0x48d   : > { %v2169_v48 = vpop.eup %1719  ;;  %874 = vadd.xlane.f32.xlu0 %v873_v52 }
 0x48e   : > { %v870_v16 = vsel %vm809_vm1, %v2169_v48, 0.0 }
 0x48f   : > { %v2173_v17 = vpop.eup %1721  ;;  %871 = vadd.xlane.f32.xlu1 %v870_v16 }
 0x490   : > { %v879_v18 = vsel %vm809_vm1, %v2173_v17, 0.0 }
 0x491   : > { %v2177_v62 = vpop.eup %1723  ;;  %880 = vadd.xlane.f32.xlu0 %v879_v18 }
 0x492   : > { %v876_v21 = vsel %vm809_vm1, %v2177_v62, 0.0 }
 0x493   : > { %877 = vadd.xlane.f32.xlu1 %v876_v21 }
 0x4a4   : > { %1029 = vperm.xlu1 %1662, %v295_v9  }
 0x4a7   : > { %1034 = vperm.xlu0 %1661, %v296_v5  }
 0x4a8   : > { %1039 = vperm.xlu1 %1662, %v297_v24  }
 0x4ab   : > { %1049 = vperm.xlu0 %1661, %v299_v26   ;;  %v1175_v26 = vpop.f32.mrf.mxu0 }
 0x4ac   : > { %1044 = vperm.xlu1 %1662, %v298_v20  }
 0x4af   : > { %1059 = vperm.xlu0 %1661, %v301_v22  }
 0x4b0   : > { %1054 = vperm.xlu1 %1662, %v300_v58  }
 0x4b4   : > { %1064 = vperm.xlu1 %1662, %v302_v25  }
 0x50e   : > { %v863_v34 = vpop.xlane.xlu0 %862 }
 0x50f   : > { %1725 = vrcp.f32 %v863_v34 }
 0x510   : > { %v860_v36 = vpop.xlane.xlu1 %859 }
 0x511   : > { %1727 = vrcp.f32 %v860_v36 }
 0x512   : > { %v869_v37 = vpop.xlane.xlu0 %868 }
 0x513   : > { %1729 = vrcp.f32 %v869_v37 }
 0x514   : > { %v866_v40 = vpop.xlane.xlu1 %865 }
 0x515   : > { %1731 = vrcp.f32 %v866_v40 }
 0x516   : > { %v875_v41 = vpop.xlane.xlu0 %874 }
 0x517   : > { %1733 = vrcp.f32 %v875_v41 }
 0x518   : > { %v872_v44 = vpop.xlane.xlu1 %871 }
 0x519   : > { %1735 = vrcp.f32 %v872_v44 }
 0x51a   : > { %v881_v46 = vpop.xlane.xlu0 %880 }
 0x51c   : > { %v878_v47 = vpop.xlane.xlu1 %877  ;;  %v1726_v49 = vpop.eup %1725 }
 0x51d   : > { %1737 = vrcp.f32 %v878_v47  ;;  %v891_v53 = vmul.f32 %v1726_v49, %v2149_v7 }
 0x51e   : > { %v1728_v50 = vpop.eup %1727  ;;  %1739 = vrcp.f32 %v881_v46 }
 0x51f   : > { %v890_v51 = vmul.f32 %v1728_v50, %v2153_v10 }
 0x520   : > { %v1030_v54 = vpop.permute.xlu1 %1029  ;;  %v1730_v56 = vpop.eup %1729 }
 0x521   : > { %v1144_v57 = vadd.f32 %v1143_v28, %v1030_v54  ;;  %v1146_v59 = vadd.f32 %v1145_v30, %v1030_v54  ;;  %1606 = vmatprep.mubr.msk.f32.mxu1 %vm809_vm1, %v890_v51  ;;  %v893_v7 = vmul.f32 %v1730_v56, %v2157_v12 }
 0x522   : > { %v1732_v60 = vpop.eup %1731  ;;  %v1035_v61 = vpop.permute.xlu0 %1034  ;;  %1607 = vmatmul.mubr.msk.f32.vlgmr.msra.gmra.mxu1 %vm809_vm1, %v891_v53 }
 0x523   : > { %v2215_v63 = vmax.f32 %v1144_v57, 0.0  ;;  %v2217_v1 = vmax.f32 %v1146_v59, 0.0  ;;  %v1148_v2 = vadd.f32 %v1147_v15, %v1035_v61  ;;  %v1150_v3 = vadd.f32 %v1149_v27, %v1035_v61 }
 0x524   : > { %v1040_v23 = vpop.permute.xlu1 %1039  ;;  %v892_v19 = vmul.f32 %v1732_v60, %v2161_v38  ;;  %v1734_v32 = vpop.eup %1733 }
 0x525   : > { %v2220_v29 = vmax.f32 %v1148_v2, 0.0  ;;  %v2222_v6 = vmax.f32 %v1150_v3, 0.0  ;;  %v1198_v10 = vmul.f32 %v2215_v63, %v2215_v63  ;;  %v1199_v11 = vmul.f32 %v2217_v1, %v2217_v1 }
 0x526   : > { %v1736_v8 = vpop.eup %1735  ;;  %v1154_v42 = vadd.f32 %v1153_v31, %v1040_v23  ;;  %v1156_v13 = vadd.f32 %v1155_v33, %v1040_v23  ;;  %1609 = vmatprep.mubr.msk.f32.mxu1 %vm809_vm1, %v892_v19  ;;  %v1050_v38 = vpop.permute.xlu0 %1049  ;;  %v895_v25 = vmul.f32 %v1734_v32, %v2165_v14 }
 0x527   : > { %v1200_v52 = vmul.f32 %v2220_v29, %v2220_v29  ;;  %v1201_v16 = vmul.f32 %v2222_v6, %v2222_v6  ;;  %v1164_v18 = vadd.f32 %v1163_v39, %v1050_v38  ;;  %v1166_v12 = vadd.f32 %v1165_v43, %v1050_v38  ;;  %1610 = vmatmul.mubr.msk.f32.gmra.mxu1 %vm809_vm1, %v893_v7  ;;  %v1177_v31 = vpop.f32.mrf.mxu0 }
 0x528   : > { %v2235_v21 = vmax.f32 %v1154_v42, 0.0  ;;  %v2237_v9 = vmax.f32 %v1156_v13, 0.0  ;;  %v1045_v5 = vpop.permute.xlu1 %1044  ;;  %v894_v24 = vmul.f32 %v1736_v8, %v2169_v48 }
 0x529   : > { %v1214_v20 = vadd.f32 %v1200_v52, %v1198_v10  ;;  %v1227_v22 = vadd.f32 %v1201_v16, %v1199_v11  ;;  %v2240_v58 = vmax.f32 %v1164_v18, 0.0  ;;  %v1158_v15 = vadd.f32 %v2205_v0, %v1045_v5  ;;  %v1179_v51 = vpop.f32.mrf.mxu0 }
 0x52a   : > { %v1202_v28 = vmul.f32 %v2235_v21, %v2235_v21  ;;  %v1203_v30 = vmul.f32 %v2237_v9, %v2237_v9  ;;  %v1160_v27 = vadd.f32 %v2207_v35, %v1045_v5  ;;  %1612 = vmatprep.mubr.msk.f32.mxu1 %vm809_vm1, %v894_v24  ;;  %v1060_v48 = vpop.permute.xlu0 %1059  ;;  %v1738_v33 = vpop.eup %1737  ;;  %v2250_v34 = vmax.f32 %v1166_v12, 0.0 }
 0x52b   : > { %1613 = vmatmul.mubr.msk.f32.gmra.mxu1 %vm809_vm1, %v895_v25  ;;  %v1740_v14 = vpop.eup %1739  ;;  %v2253_v36 = vmax.f32 %v1158_v15, 0.0  ;;  %v1174_v39 = vadd.f32 %v1173_v4, %v1060_v48  ;;  %v1176_v40 = vadd.f32 %v1175_v26, %v1060_v48  ;;  %v1206_v35 = vmul.f32 %v2240_v58, %v2240_v58 }
 0x52c   : > { %v2255_v37 = vmax.f32 %v1160_v27, 0.0  ;;  %v1055_v41 = vpop.permute.xlu1 %1054  ;;  %v1215_v0 = vadd.f32 %v1214_v20, %v1202_v28  ;;  %v1228_v46 = vadd.f32 %v1227_v22, %v1203_v30  ;;  %v896_v50 = vmul.f32 %v1738_v33, %v2177_v62 }
 0x52d   : > { %v1168_v43 = vadd.f32 %v2209_v45, %v1055_v41  ;;  %v1170_v44 = vadd.f32 %v1169_v55, %v1055_v41  ;;  %v1204_v47 = vmul.f32 %v2253_v36, %v2253_v36  ;;  %v1207_v53 = vmul.f32 %v2250_v34, %v2250_v34 }
 0x52e   : > { %v1205_v49 = vmul.f32 %v2255_v37, %v2255_v37  ;;  %v897_v57 = vmul.f32 %v1740_v14, %v2173_v17  ;;  %v1194_v55 = vmax.f32 %v1174_v39, 0.0  ;;  %v1195_v60 = vmax.f32 %v1176_v40, 0.0  ;;  %1615 = vmatprep.mubr.msk.f32.mxu1 %vm809_vm1, %v896_v50 }
 0x52f   : > { %v1192_v54 = vmax.f32 %v1168_v43, 0.0  ;;  %v1193_v56 = vmax.f32 %v1170_v44, 0.0  ;;  %v1216_v59 = vadd.f32 %v1215_v0, %v1204_v47 }
 0x530   : > { %v1229_v45 = vadd.f32 %v1228_v46, %v1205_v49  ;;  %v1065_v61 = vpop.permute.xlu1 %1064  ;;  %1616 = vmatmul.mubr.msk.f32.gmra.mxu1 %vm809_vm1, %v897_v57  ;;  %v1210_v8 = vmul.f32 %v1194_v55, %v1194_v55  ;;  %v1211_v10 = vmul.f32 %v1195_v60, %v1195_v60 }
 0x531   : > { %v1208_v2 = vmul.f32 %v1192_v54, %v1192_v54  ;;  %v1209_v3 = vmul.f32 %v1193_v56, %v1193_v56  ;;  %v1178_v62 = vadd.f32 %v1177_v31, %v1065_v61  ;;  %v1180_v23 = vadd.f32 %v1179_v51, %v1065_v61 }
 0x532   : > { %v1217_v19 = vadd.f32 %v1216_v59, %v1206_v35  ;;  %v1230_v4 = vadd.f32 %v1229_v45, %v1207_v53 }
 0x533   : > { %v1196_v32 = vmax.f32 %v1178_v62, 0.0  ;;  %v1197_v7 = vmax.f32 %v1180_v23, 0.0 }
 0x534   : > { %v1218_v17 = vadd.f32 %v1217_v19, %v1208_v2  ;;  %v1231_v11 = vadd.f32 %v1230_v4, %v1209_v3 }
 0x535   : > { %v1212_v42 = vmul.f32 %v1196_v32, %v1196_v32  ;;  %v1213_v13 = vmul.f32 %v1197_v7, %v1197_v7 }
 0x536   : > { %v1219_v38 = vadd.f32 %v1218_v17, %v1210_v8  ;;  %v1232_v52 = vadd.f32 %v1231_v11, %v1211_v10 }
 0x538   : > { %v1220_v16 = vadd.f32 %v1219_v38, %v1212_v42  ;;  %v1233_v18 = vadd.f32 %v1232_v52, %v1213_v13 }
 0x53a   : > { %v1221_v12 = vrot.slane %v1220_v16, 4  ;;  %v1234_v5 = vrot.slane %v1233_v18, 4 }
 0x53c   : > { %v1222_v24 = vadd.f32 %v1221_v12, %v1220_v16  ;;  %v1235_v26 = vadd.f32 %v1234_v5, %v1233_v18 }
 0x53e   : > { %v1223_v20 = vrot.slane %v1222_v24, 2  ;;  %v1236_v22 = vrot.slane %v1235_v26, 2 }
 0x540   : > { %v1224_v25 = vadd.f32 %v1223_v20, %v1222_v24  ;;  %v1237_v28 = vadd.f32 %v1236_v22, %v1235_v26 }
 0x542   : > { %v1225_v30 = vrot.slane %v1224_v25, 1  ;;  %v1238_v15 = vrot.slane %v1237_v28, 1 }
 0x544   : > { %v1226_v27 = vadd.f32 %v1225_v30, %v1224_v25  ;;  %v1239_v48 = vadd.f32 %v1238_v15, %v1237_v28 }
 0x546   : > { %v1240_v31 = vmax.f32 %v1226_v27, 1e-24  ;;  %v1241_v33 = vmax.f32 %v1239_v48, 1e-24 }
 0x548   : > { %1741 = vrsqrt.f32 %v1240_v31 }
 0x549   : > { %1743 = vrsqrt.f32 %v1241_v33 }
 0x555   : > { %v1742_v14 = vpop.eup %1741 }
 0x556   : > { %v1744_v39 = vpop.eup %1743  ;;  %v1258_v40 = vmul.f32 %v1742_v14, %v1196_v32  ;;  %v1256_v35 = vmul.f32 %v1742_v14, %v1194_v55  ;;  %v1254_v44 = vmul.f32 %v1742_v14, %v1192_v54  ;;  %v1252_v47 = vmul.f32 %v1742_v14, %v2240_v58 }
 0x557   : > { %v1259_v41 = vmul.f32 %v1744_v39, %v1197_v7  ;;  %v1257_v0 = vmul.f32 %v1744_v39, %v1195_v60  ;;  %v1255_v43 = vmul.f32 %v1744_v39, %v1193_v56  ;;  %v1253_v46 = vmul.f32 %v1744_v39, %v2250_v34 }
 0x558   : > { %v1251_v49 = vmul.f32 %v1744_v39, %v2255_v37  ;;  %v1250_v50 = vmul.f32 %v1742_v14, %v2253_v36  ;;  %v1249_v51 = vmul.f32 %v1744_v39, %v2237_v9  ;;  %v1248_v53 = vmul.f32 %v1742_v14, %v2235_v21 }
 0x559   : > { %1314 = vmatprep.subr.mxu0 %v1259_v41  ;;  %v1247_v54 = vmul.f32 %v1744_v39, %v2222_v6  ;;  %v1246_v34 = vmul.f32 %v1742_v14, %v2220_v29  ;;  %v1245_v58 = vmul.f32 %v1744_v39, %v2217_v1  ;;  %v1244_v37 = vmul.f32 %v1742_v14, %v2215_v63 }
 0x55a   : > { %1315 = vmatpush1.msra.mxu0 %v1258_v40  ;;  %v1808_v36 = vmov 0.0  }
 0x55b   : > { %1316 = vmatprep.subr.mxu0 %v1257_v0  ;;  %1362 = vmatprep.mubr.f32.mxu0 %v1808_v36 }
 0x55c   : > { %1317 = vmatpush1.msra.mxu0 %v1256_v35 }
 0x55d   : > { %1318 = vmatprep.subr.mxu0 %v1255_v43 }
 0x55e   : > { %1319 = vmatpush1.msra.mxu0 %v1254_v44 }
 0x55f   : > { %1320 = vmatprep.subr.mxu0 %v1253_v46 }
 0x560   : > { %1321 = vmatpush1.msra.mxu0 %v1252_v47 }
 0x561   : > { %1322 = vmatprep.subr.mxu0 %v1251_v49 }
 0x562   : > { %1323 = vmatpush1.msra.mxu0 %v1250_v50 }
 0x563   : > { %1324 = vmatprep.subr.mxu0 %v1249_v51 }
 0x564   : > { %1325 = vmatpush1.msra.mxu0 %v1248_v53 }
 0x565   : > { %1326 = vmatprep.subr.mxu0 %v1247_v54 }
 0x566   : > { %1327 = vmatpush1.msra.mxu0 %v1246_v34 }
 0x567   : > { %1328 = vmatprep.subr.mxu0 %v1245_v58 }
 0x568   : > { %1329 = vmatpush1.msra.mxu0 %v1244_v37 }
 0x5e2   : > { %v1608_v9 = vpop.f32.mrf.mxu1 }
 0x5e4   : > { %v988_v56 = vpop.f32.mrf.mxu1 }
 0x5e5   : > { %1260 = vxpose.xlu0.b32.start [1/8] (short) (narrow) %v988_v56, 16 }
 0x5e7   : > { %v1611_v21 = vpop.f32.mrf.mxu1 }
 0x5e9   : > { %1261 = vxpose.xlu0.b32.cont [2/8] (short) (narrow) %v1608_v9, 16  ;;  %v998_v57 = vpop.f32.mrf.mxu1 }
 0x5eb   : > { %v1614_v6 = vpop.f32.mrf.mxu1 }
 0x5ed   : > { %1262 = vxpose.xlu0.b32.cont [3/8] (short) (narrow) %v998_v57, 16  ;;  %v1008_v29 = vpop.f32.mrf.mxu1 }
 0x5f0   : > { %v1617_v1 = vpop.f32.mrf.mxu1 }
 0x5f1   : > { %1263 = vxpose.xlu0.b32.cont [4/8] (short) (narrow) %v1611_v21, 16 }
 0x5f2   : > { %v1018_v63 = vpop.f32.mrf.mxu1 }
 0x5f5   : > { %1264 = vxpose.xlu0.b32.cont [5/8] (short) (narrow) %v1008_v29, 16 }
 0x5f9   : > { %1265 = vxpose.xlu0.b32.cont [6/8] (short) (narrow) %v1614_v6, 16 }
 0x5fd   : > { %1266 = vxpose.xlu0.b32.cont [7/8] (short) (narrow) %v1018_v63, 16 }
 0x601   : > { %1267 = vxpose.xlu0.b32.end [8/8] (short) (narrow) %v1617_v1, 16 }
 0x661   : > { %v1276_v59 = vpop.trf.xlu0 }
 0x662   : > { %1520 = vmatmul.mubr.msk.f32.vlgmr.msra.gmra.mxu0 %vm809_vm1, %v1276_v59 }
 0x663   : > { %1368 = vmatprep.mubr.f32.mxu0 %v1808_v36 }
 0x665   : > { %v1277_v45 = vpop.trf.xlu0 }
 0x666   : > { %1521 = vmatmul.mubr.msk.f32.gmra.mxu0 %vm809_vm1, %v1277_v45 }
 0x722   : > { %v1364_v55 = vpop.f32.mrf.mxu0 }
 0x723   : > { %1375 = vst [vmem:[%s259_s29] sm:$0xff] %v1364_v55 }
 0x724   : > { %v1366_v60 = vpop.f32.mrf.mxu0 }
 0x725   : > { %1376 = vst [vmem:[%s259_s29 + $0x8] sm:$0xff] %v1366_v60 }
 0x726   : > { %v1370_v61 = vpop.f32.mrf.mxu0 }
 0x727   : > { %1377 = vst [vmem:[%s259_s29 + $0x10] sm:$0xff] %v1370_v61 }
 0x728   : > { %v1372_v2 = vpop.f32.mrf.mxu0 }
 0x729   : > { %1378 = vst [vmem:[%s259_s29 + $0x18] sm:$0xff] %v1372_v2 }
 0x72a   : > { %1758 = shalt.err (!%p1755_p3)
}
 0x72b   : > { %s1759_s17 = scalar_lea.hbm %s2289_s14, 512  ;;  %s1763_s20 = scalar_lea.hbm %s2337_s6, 1024 }
 0x72c   : > { %p1760_p4 = scmp.ne.s32.totalorder %s2289_s14, %s1759_s17  ;;  %p1764_p9 = scmp.lt.s32.totalorder %s2289_s14, %s2337_s6 }
 0x72d   : > { %p1765_p10 = scmp.lt.s32.totalorder %s1763_s20, %s1759_s17 }
 0x72e   : > { %p1761_p7 = pnand %p1760_p4, %p1885_p5 }
 0x72f   : > { %p1766_p11 = por %p1765_p10, %p1764_p9 }
 0x730   : > { %p1762_p8 = pneg %p1761_p7 }
 0x732   : > { %p1767_p12 = pnand %p1766_p11, %p1762_p8 }
 0x734   : > { %1770 = shalt.err (!%p1767_p12)
}
 0x735   : > { %s1810_s11 = smov 256   ;;  %s1811_s12 = smov 16  }
 0x736   : > { %1618 = dma.vmem_to_hbm [thread:$0]  (%p1885_p5), %s2284_s9, 512, %s2289_s14, %s2291_s10, %s1810_s11, %s1810_s11, %s1811_s12  }
 0x737 PF: > { %p1624_p13 = scmp.ge.s32.totalorder %s1805_s24, 2  ;;  %s1408_s13 = sand.u32 1, %s1793_s21  }
 0x738   : > { %s1409_s15 = scalar_lea.sflag [#allocation3], %s1408_s13 }
 0x739   : > { %p1621_p0 = pnand %p1624_p13, %p1889_p6 }
 0x73b   : > { %p1622_p1 = pneg %p1621_p0 }
 0x73d   : > { %1788 = dma.done.wait (%p1622_p1), %s1409_s15, 512  }
 0x73e   : > { %1790 = vsyncadd (%p1622_p1), %s1409_s15, 4294966784  ;;  %p16_p2 = scmp.ge.s32.totalorder %s1872_s27, 4   ;;  %s2340_s21 = smov %s1797_s22 }
 0x73f   : > { %s2341_s22 = smov %s1801_s23  ;;  %s2342_s23 = smov %s1883_s30 }
 0x740   : > { %s2343_s24 = smov %s1872_s27  ;;  %18 = sbr.rel (!%p16_p2) target bundleno = 3 (0x3), region = 82 }
 0x745   :  { %1414 = vsyncpa [#allocation3], 1 }
 0x746   :  { %1416 = vsyncpa [#allocation3 + $0x1], 1 }

</bundles_post_ra>
